<compile_context>
chip_gen: v5e
topology: v5e:2x2
jax: 0.10.0
libtpu: 0.0.40
codegen_flags: <defaults>
</compile_context>

<pallas_src>
import jax
import jax.numpy as jnp
from jax.experimental import pallas as pl
from jax.experimental.pallas import tpu as pltpu

LANES = 128            # vreg lane width
MAX_TILE_ROWS = 4096   # 4096*128*4B = 2 MiB f32 per buffer; (in+out) double-
                       # buffered = 8 MiB, inside default scoped VMEM on
                       # v5e (16 MiB) / v6e (32 MiB) / v7x (32 MiB of 64 MiB).
SUBLANE_MULTIPLE = 32  # dtype-safe sublane round-up (8 f32 / 16 bf16 / 32 int8)


def linear_kernel(p_ref, x_ref, o_ref):
    # p_ref: (2,) f32 in SMEM -> [w, b].  x_ref/o_ref: (tile_rows, 128) VMEM.
    w = p_ref[0]
    b = p_ref[1]
    # Single VPU multiply-add per tile, computed in f32 irrespective of the
    # input dtype (keeps bf16 inputs numerically close to the f32 reference).
    o_ref[...] = (x_ref[...].astype(jnp.float32) * w + b).astype(o_ref.dtype)


def _linear_slab(x2, params):
    """Fast path: x2 is a lane-dense (rows, 128) slab, params is (2,) f32 [w, b]."""
    rows = x2.shape[0]

    tile_rows = min(MAX_TILE_ROWS, rows)
    tile_rows = pl.cdiv(tile_rows, SUBLANE_MULTIPLE) * SUBLANE_MULTIPLE
    grid = (pl.cdiv(rows, tile_rows),)   # ragged last block handled by Pallas:
                                         # OOB reads discarded, OOB writes dropped.

    return pl.pallas_call(
        linear_kernel,
        out_shape=jax.ShapeDtypeStruct((rows, LANES), x2.dtype),
        grid=grid,
        in_specs=[
            # Scalar parameters live in 1-D SMEM: no padded (8,128) VMEM tile,
            # no per-parameter VMEM DMA buffer.
            pl.BlockSpec((2,), lambda i: (0,),
                         memory_space=pltpu.MemorySpace.SMEM),
            # Lane-dense, large-block, double-buffered input stream.
            pl.BlockSpec((tile_rows, LANES), lambda i: (i, 0)),
        ],
        out_specs=pl.BlockSpec((tile_rows, LANES), lambda i: (i, 0)),
        compiler_params=pltpu.CompilerParams(
            # Independent row-tiles: shard grid steps across TensorCores
            # (matters on v7x's 2 TCs per chip when the grid has >= 2 steps).
            dimension_semantics=("parallel",),
        ),
    )(params, x2)


def linear_forward(x, w, b):
    """x: (N, 1), w: (1, 1), b: (1,)  ->  (N, 1); y = x @ W^T + b."""
    orig_shape = x.shape

    params = jnp.concatenate([w.reshape(-1), b.reshape(-1)]).astype(jnp.float32)

    # Lane-dense repack. Pad ONLY up to the next multiple of 128 (never to a
    # whole tile), and skip the pad / final slice entirely when N % 128 == 0.
    flat = x.reshape(-1)
    total = flat.shape[0]
    rows = pl.cdiv(total, LANES)
    aligned_total = rows * LANES

    if aligned_total != total:
        flat = jnp.pad(flat, (0, aligned_total - total))
    x2 = flat.reshape(rows, LANES)

    out = _linear_slab(x2, params)

    out_flat = out.reshape(-1)
    if aligned_total != total:
        out_flat = out_flat[:total]
    return out_flat.reshape(orig_shape)


if __name__ == "__main__":
    key = jax.random.PRNGKey(0)
    kx1, kx2, kx3, kw, kb = jax.random.split(key, 5)

    # Deterministic parameters with nn.Linear(1, 1) shapes.
    w = jax.random.uniform(kw, (1, 1), dtype=jnp.float32, minval=-1.0, maxval=1.0)
    b = jax.random.uniform(kb, (1,), dtype=jnp.float32, minval=-1.0, maxval=1.0)

    # Tiny batch, (N, 1) like PyTorch (batch, in_features). NOTE: at these
    # sizes the call is pure launch/DMA overhead — correctness demo only.
    x1 = jax.random.normal(kx1, (8, 1), dtype=jnp.float32)
    y1 = jax.block_until_ready(linear_forward(x1, w, b))
    assert y1.shape == (8, 1)
    assert jnp.allclose(y1, x1 @ w.T + b, atol=1e-6), "mismatch (N=8)"

    # N not a multiple of 128: exercises the minimal pad + slice path and the
    # ragged (partial) row-block in the grid.
    x2 = jax.random.normal(kx2, (300, 1), dtype=jnp.float32)
    y2 = jax.block_until_ready(linear_forward(x2, w, b))
    assert y2.shape == (300, 1)
    assert jnp.allclose(y2, x2 @ w.T + b, atol=1e-6), "mismatch (N=300)"

    # N a multiple of 128: exercises the zero-pad / zero-slice fast path.
    x3 = jax.random.normal(kx3, (256, 1), dtype=jnp.float32)
    y3 = jax.block_until_ready(linear_forward(x3, w, b))
    assert y3.shape == (256, 1)
    assert jnp.allclose(y3, x3 @ w.T + b, atol=1e-6), "mismatch (N=256)"

    print("KERNEL_OK")
</pallas_src>

<mosaic_0001>
module attributes {stable_mosaic.version = 11 : i64} {
  func.func @linear_kernel(%arg0: i32, %arg1: memref<2xf32, #tpu.memory_space<smem>>, %arg2: memref<32x128xf32, #tpu.memory_space<vmem>>, %arg3: memref<32x128xf32, #tpu.memory_space<vmem>>) attributes {dimension_semantics = [#tpu.dimension_semantics<parallel>], iteration_bounds = array<i64: 1>, scalar_prefetch = 0 : i64, scratch_operands = 0 : i64, tpu.core_type = #tpu.core_type<tc>, window_params = [{transform_indices = @transform_0, window_bounds = array<i64: 2>}, {transform_indices = @transform_1, window_bounds = array<i64: 32, 128>}, {transform_indices = @transform_2, window_bounds = array<i64: 32, 128>}]} {
    %c0 = arith.constant 0 : index
    %0 = memref.load %arg1[%c0] : memref<2xf32, #tpu.memory_space<smem>>
    %c1 = arith.constant 1 : index
    %1 = memref.load %arg1[%c1] : memref<2xf32, #tpu.memory_space<smem>>
    %c0_0 = arith.constant 0 : index
    %c0_1 = arith.constant 0 : index
    %2 = vector.load %arg2[%c0_0, %c0_1] : memref<32x128xf32, #tpu.memory_space<vmem>>, vector<32x128xf32>
    %3 = vector.broadcast %0 : f32 to vector<32x128xf32>
    %4 = arith.mulf %2, %3 : vector<32x128xf32>
    %5 = vector.broadcast %1 : f32 to vector<32x128xf32>
    %6 = arith.addf %4, %5 : vector<32x128xf32>
    %c0_2 = arith.constant 0 : index
    %c0_3 = arith.constant 0 : index
    %7 = vector.load %arg3[%c0_2, %c0_3] : memref<32x128xf32, #tpu.memory_space<vmem>>, vector<32x128xf32>
    tpu.vector_store %arg3[%c0_2, %c0_3], %6 {strides = array<i32>} : memref<32x128xf32, #tpu.memory_space<vmem>>, vector<32x128xf32>,
    return
  }
  func.func @transform_0(%arg0: i32) -> i32 {
    %c0_i32 = arith.constant 0 : i32
    %c0_i32_0 = arith.constant 0 : i32
    return %c0_i32 : i32
  }
  func.func @transform_1(%arg0: i32) -> (i32, i32) {
    %c0_i32 = arith.constant 0 : i32
    %c0_i32_0 = arith.constant 0 : i32
    return %arg0, %c0_i32 : i32, i32
  }
  func.func @transform_2(%arg0: i32) -> (i32, i32) {
    %c0_i32 = arith.constant 0 : i32
    %c0_i32_0 = arith.constant 0 : i32
    return %arg0, %c0_i32 : i32, i32
  }
}

</mosaic_0001>

<bundles_post_ra>
// kernel: tpu_custom_call.1
= control target key start
LH: loop header
LB: loop body
LE: loop exit
PB: predicated region body
PF: predicated region fallthrough
CT: control target
= control target key end

     0   :  { %7 = vsyncpa [#allocation5], 0  ;;  %s188_s0 = inlined_call_operand.hbm [shape: f32[2], index: 0, kind: input, shape index: {}]   ;;  %s189_s1 = inlined_call_operand.hbm [shape: f32[1,128], index: 1, kind: input, shape index: {}]   ;;  %s190_s2 = inlined_call_operand.hbm [shape: f32[1,128], index: 2, kind: output, shape index: {}]  }
   0x1   :  { %8 = vsyncpa [#allocation3], 0 }
   0x2   :  { %9 = vsyncpa [#allocation4], 0  ;;  %s15_s11 = sshll.u32 %s188_s0, 4  ;;  %s153_s12 = smov [#allocation2]   ;;  %s16_s11 = int_to_ptr.hbm [resolvable:$true] %s15_s11 }
   0x3   :  { %18 = dma.hbm_to_smem %s16_s11, 16, %s153_s12, [#allocation5]  }
   0x4   :  { %22 = vsyncadd [#allocation3], 496  ;;  %s23_s15 = sshll.u32 %s189_s1, 4  ;;  %s154_s16 = smov [#allocation6]   ;;  %s24_s15 = int_to_ptr.hbm [resolvable:$true] %s23_s15 }
   0x5   :  { %s25_s17 = sshll.u32 %s154_s16, 4  ;;  %s155_s18 = smov 16   ;;  %s26_s17 = int_to_ptr.vmem [resolvable:$true] %s25_s17 }
   0x6   :  { %s156_s19 = smov 1  }
   0x7   :  { %31 = dma.hbm_to_vmem [thread:$0]  %s24_s15, 16, %s26_s17, [#allocation3], %s155_s18, %s155_s18, %s156_s19  }
   0x8   :  { %147 = dma.done.wait [#allocation5], 16  }
   0x9   :  { %148 = vsyncadd [#allocation5], 4294967280 }
   0xa   :  { %149 = dma.done.wait [#allocation3], 512  }
   0xb   :  { %150 = vsyncadd [#allocation3], 4294966784 }
   0xc   :  { %40 = sfence }
   0xd   :  { %s41_s0 = sld [smem:[#allocation2]]  ;;  %v43_v0 = vld [vmem:[#allocation6] sm:$0xff]  ;;  %v44_v1 = vld [vmem:[#allocation6 + $0x8] sm:$0xff]  ;;  %v45_v2 = vld [vmem:[#allocation6 + $0x10] sm:$0xff] }
   0xe   :  { %s81_s20 = sld [smem:[#allocation2 + $0x1]]  ;;  %v46_v3 = vld [vmem:[#allocation6 + $0x18] sm:$0xff] }
  0x13   :  { %v47_v4 = vstv %s41_s0 }
  0x14   :  { %v48_v5 = vmul.f32 %v47_v4, %v43_v0  ;;  %v52_v6 = vstv %s81_s20  ;;  %v49_v7 = vmul.f32 %v47_v4, %v44_v1  ;;  %v50_v8 = vmul.f32 %v47_v4, %v45_v2 }
  0x15   :  { %v51_v9 = vmul.f32 %v47_v4, %v46_v3 }
  0x16   :  { %v53_v10 = vadd.f32 %v52_v6, %v48_v5  ;;  %v54_v11 = vadd.f32 %v52_v6, %v49_v7  ;;  %v55_v12 = vadd.f32 %v52_v6, %v50_v8 }
  0x17   :  { %v56_v13 = vadd.f32 %v52_v6, %v51_v9 }
  0x18   :  { %57 = vst [vmem:[#allocation7] sm:$0xff] %v53_v10 }
  0x19   :  { %58 = vst [vmem:[#allocation7 + $0x8] sm:$0xff] %v54_v11 }
  0x1a   :  { %59 = vst [vmem:[#allocation7 + $0x10] sm:$0xff] %v55_v12 }
  0x1b   :  { %60 = vst [vmem:[#allocation7 + $0x18] sm:$0xff] %v56_v13 }
  0x1c   :  { %64 = vsyncadd [#allocation4], 496  ;;  %s67_s22 = sshll.u32 %s190_s2, 4  ;;  %s157_s23 = smov [#allocation7]   ;;  %s68_s22 = int_to_ptr.hbm [resolvable:$true] %s67_s22 }
  0x1d   :  { %s65_s24 = sshll.u32 %s157_s23, 4  ;;  %s66_s24 = int_to_ptr.vmem [resolvable:$true] %s65_s24 }
  0x1e   :  { %73 = dma.vmem_to_hbm [thread:$0]  %s66_s24, 16, %s68_s22, [#allocation4], %s155_s18, %s155_s18, %s156_s19  }
  0x1f   :  { %151 = dma.done.wait [#allocation4], 512  }
  0x20   :  { %152 = vsyncadd [#allocation4], 4294966784 }
  0x21   :  { %78 = vsyncpa [#allocation3], 1 }
  0x22   :  { %79 = vsyncpa [#allocation4], 1 }
  0x23   :  { %80 = vsyncpa [#allocation5], 1 }

</bundles_post_ra>
